<compile_context>
chip_gen: v7x
topology: tpu7x:2x2x1
jax: 0.10.0
libtpu: 0.0.40
codegen_flags: <defaults>
</compile_context>

<pallas_src>
import jax
import jax.numpy as jnp
from jax import lax
from jax.experimental import pallas as pl
from jax.experimental.pallas import tpu as pltpu

EPS = 1e-5  # nn.InstanceNorm2d default eps


def _binorm_kernel(x_ref, gb_ref, o_ref):
    # x_ref: (row_tile, S); gb_ref: (row_tile, 2) with [:,0]=gamma, [:,1]=beta.
    x = x_ref[...].astype(jnp.float32)
    gb = gb_ref[...].astype(jnp.float32)
    g = gb[:, 0:1]
    b = gb[:, 1:2]

    mean = jnp.mean(x, axis=-1, keepdims=True)        # XLU row reduction
    xc = x - mean
    var = jnp.mean(xc * xc, axis=-1, keepdims=True)   # biased variance (PyTorch semantics)
    inv = lax.rsqrt(var + EPS)                        # EUP

    # Fold normalization + affine into one per-row scale/shift:
    #   (x - mean) * inv * g + b == x * scale + shift
    scale = inv * g
    shift = b - mean * scale
    o_ref[...] = (x * scale + shift).astype(o_ref.dtype)


def _pick_row_tile(R, S, itemsize, *, target_block_bytes=4 << 20):
    """Largest row tile whose (rows, S) x-block is ~target_block_bytes."""
    sub = 8 if itemsize >= 4 else 16       # sublane granularity (f32 vs packed 16-bit)
    rows = (target_block_bytes // max(S * itemsize, 1)) // sub * sub
    rows = max(sub, rows)
    r_pad = pl.cdiv(R, sub) * sub
    rows = min(rows, r_pad)
    # Keep >= 2 grid steps when possible so "parallel" can shard across the two
    # TensorCores on v7x (megacore); also avoids one monolithic DMA.
    if r_pad >= 2 * sub:
        rows = min(rows, (r_pad // 2) // sub * sub)
    return max(rows, sub)


def binorm_forward(x, gamma, beta, norm_bin, *, row_tile=None):
    """x: (N, C, H, W); gamma/beta: (norm_bin, C) per-bin per-channel affine."""
    N, C, H, W = x.shape
    assert H % norm_bin == 0, "H must be divisible by norm_bin (as in the PyTorch module)"
    Hb = H // norm_bin
    R = N * C * norm_bin
    S = Hb * W
    item = jnp.dtype(x.dtype).itemsize

    # (N, C, H, W) -> (N, C, norm_bin, Hb, W) -> (R, S); row order = (n, c, bin)
    x2 = x.reshape(N, C, norm_bin, Hb, W).reshape(R, S)

    # Per-row affine params merged into a single (R, 2) input: gamma[bin, c] / beta[bin, c]
    # broadcast to row index n*C*norm_bin + c*norm_bin + bin.
    g_row = jnp.broadcast_to(gamma.T[None, :, :], (N, C, norm_bin)).reshape(R)
    b_row = jnp.broadcast_to(beta.T[None, :, :], (N, C, norm_bin)).reshape(R)
    gb_row = jnp.stack([g_row, b_row], axis=-1).astype(jnp.float32)  # (R, 2)

    if row_tile is None:
        row_tile = _pick_row_tile(R, S, item)
    grid = (pl.cdiv(R, row_tile),)

    # Explicit VMEM budget: double-buffered x-in + x-out blocks plus the
    # lane-padded (128-wide) gb block, with headroom; capped for v7x's 64 MiB VMEM.
    x_blk = row_tile * S * item
    gb_blk = row_tile * 128 * 4
    need = 2 * (2 * x_blk + gb_blk)
    vmem_limit = int(min(max(need * 3 // 2 + (4 << 20), 16 << 20), 48 << 20))

    cost = pl.CostEstimate(
        flops=int(8 * R * S),
        transcendentals=int(R),
        bytes_accessed=int(2 * R * S * item + R * 2 * 4),
    )

    out2 = pl.pallas_call(
        _binorm_kernel,
        out_shape=jax.ShapeDtypeStruct((R, S), x.dtype),
        grid=grid,
        in_specs=[
            pl.BlockSpec((row_tile, S), lambda i: (i, 0)),
            pl.BlockSpec((row_tile, 2), lambda i: (i, 0)),
        ],
        out_specs=pl.BlockSpec((row_tile, S), lambda i: (i, 0)),
        compiler_params=pltpu.CompilerParams(
            dimension_semantics=("parallel",),
            vmem_limit_bytes=vmem_limit,
        ),
        cost_estimate=cost,
    )(x2, gb_row)

    return out2.reshape(N, C, norm_bin, Hb, W).reshape(N, C, H, W)


def binorm_ref(x, gamma, beta, norm_bin):
    """Pure-JAX reference with the exact PyTorch BINorm('IN', affine=True) semantics."""
    N, C, H, W = x.shape
    Hb = H // norm_bin
    xr = x.reshape(N, C, norm_bin, Hb, W).astype(jnp.float32)
    mean = xr.mean(axis=(3, 4), keepdims=True)
    var = ((xr - mean) ** 2).mean(axis=(3, 4), keepdims=True)
    y = (xr - mean) / jnp.sqrt(var + EPS)
    g = gamma.T[None, :, :, None, None]
    b = beta.T[None, :, :, None, None]
    return (y * g + b).reshape(N, C, H, W).astype(x.dtype)


if __name__ == "__main__":
    # Module config: BINorm(norm_bin=2, norm_type='IN', norm_affine=True,
    #                       channels=4, height=16, width=16, threed=False)
    norm_bin, N, C, H, W = 2, 2, 4, 16, 16

    key = jax.random.PRNGKey(0)
    kx, kg, kb = jax.random.split(key, 3)
    x = jax.random.normal(kx, (N, C, H, W), dtype=jnp.float32)
    # Deterministic per-bin per-channel affine params (PyTorch default would be
    # ones/zeros; use random values to exercise broadcasting).
    gamma = 1.0 + 0.1 * jax.random.normal(kg, (norm_bin, C), dtype=jnp.float32)
    beta = 0.1 * jax.random.normal(kb, (norm_bin, C), dtype=jnp.float32)

    out = binorm_forward(x, gamma, beta, norm_bin)
    out = jax.block_until_ready(out)

    ref = binorm_ref(x, gamma, beta, norm_bin)
    assert out.shape == (N, C, H, W)
    assert jnp.allclose(out, ref, atol=1e-4, rtol=1e-4), "mismatch vs reference"

    print("KERNEL_OK")
</pallas_src>

<mosaic_0001>
module attributes {stable_mosaic.version = 11 : i64} {
  func.func @_binorm_kernel(%arg0: i32, %arg1: memref<8x128xf32, #tpu.memory_space<vmem>>, %arg2: memref<8x2xf32, #tpu.memory_space<vmem>>, %arg3: memref<8x128xf32, #tpu.memory_space<vmem>>) attributes {dimension_semantics = [#tpu.dimension_semantics<parallel>], iteration_bounds = array<i64: 2>, scalar_prefetch = 0 : i64, scratch_operands = 0 : i64, tpu.core_type = #tpu.core_type<tc>, window_params = [{transform_indices = @transform_0, window_bounds = array<i64: 8, 128>}, {transform_indices = @transform_1, window_bounds = array<i64: 8, 2>}, {transform_indices = @transform_2, window_bounds = array<i64: 8, 128>}]} {
    %c0 = arith.constant 0 : index
    %c0_0 = arith.constant 0 : index
    %0 = vector.load %arg1[%c0, %c0_0] : memref<8x128xf32, #tpu.memory_space<vmem>>, vector<8x128xf32>
    %c0_1 = arith.constant 0 : index
    %c0_2 = arith.constant 0 : index
    %1 = vector.load %arg2[%c0_1, %c0_2] : memref<8x2xf32, #tpu.memory_space<vmem>>, vector<8x2xf32>
    %2 = vector.extract_strided_slice %1 {offsets = [0, 0], sizes = [8, 1], strides = [1, 1]} : vector<8x2xf32> to vector<8x1xf32>
    %3 = vector.extract_strided_slice %1 {offsets = [0, 1], sizes = [8, 1], strides = [1, 1]} : vector<8x2xf32> to vector<8x1xf32>
    %cst = arith.constant dense<0.000000e+00> : vector<8xf32>
    %4 = vector.multi_reduction <add>, %0, %cst [1] : vector<8x128xf32> to vector<8xf32>
    %5 = vector.shape_cast %4 : vector<8xf32> to vector<8x1xf32>
    %cst_3 = arith.constant 1.280000e+02 : f32
    %6 = vector.broadcast %cst_3 : f32 to vector<8x1xf32>
    %7 = arith.divf %5, %6 : vector<8x1xf32>
    %8 = vector.broadcast %7 : vector<8x1xf32> to vector<8x128xf32>
    %9 = arith.subf %0, %8 : vector<8x128xf32>
    %10 = arith.mulf %9, %9 : vector<8x128xf32>
    %cst_4 = arith.constant dense<0.000000e+00> : vector<8xf32>
    %11 = vector.multi_reduction <add>, %10, %cst_4 [1] : vector<8x128xf32> to vector<8xf32>
    %12 = vector.shape_cast %11 : vector<8xf32> to vector<8x1xf32>
    %cst_5 = arith.constant 1.280000e+02 : f32
    %13 = vector.broadcast %cst_5 : f32 to vector<8x1xf32>
    %14 = arith.divf %12, %13 : vector<8x1xf32>
    %cst_6 = arith.constant 9.99999974E-6 : f32
    %15 = vector.broadcast %cst_6 : f32 to vector<8x1xf32>
    %16 = arith.addf %14, %15 : vector<8x1xf32>
    %17 = math.rsqrt %16 : vector<8x1xf32>
    %18 = arith.mulf %17, %2 : vector<8x1xf32>
    %19 = arith.mulf %7, %18 : vector<8x1xf32>
    %20 = arith.subf %3, %19 : vector<8x1xf32>
    %21 = vector.broadcast %18 : vector<8x1xf32> to vector<8x128xf32>
    %22 = arith.mulf %0, %21 : vector<8x128xf32>
    %23 = vector.broadcast %20 : vector<8x1xf32> to vector<8x128xf32>
    %24 = arith.addf %22, %23 : vector<8x128xf32>
    %c0_7 = arith.constant 0 : index
    %c0_8 = arith.constant 0 : index
    %25 = vector.load %arg3[%c0_7, %c0_8] : memref<8x128xf32, #tpu.memory_space<vmem>>, vector<8x128xf32>
    tpu.vector_store %arg3[%c0_7, %c0_8], %24 {strides = array<i32>} : memref<8x128xf32, #tpu.memory_space<vmem>>, vector<8x128xf32>,
    return
  }
  func.func @transform_0(%arg0: i32) -> (i32, i32) {
    %c0_i32 = arith.constant 0 : i32
    %c0_i32_0 = arith.constant 0 : i32
    return %arg0, %c0_i32 : i32, i32
  }
  func.func @transform_1(%arg0: i32) -> (i32, i32) {
    %c0_i32 = arith.constant 0 : i32
    %c0_i32_0 = arith.constant 0 : i32
    return %arg0, %c0_i32 : i32, i32
  }
  func.func @transform_2(%arg0: i32) -> (i32, i32) {
    %c0_i32 = arith.constant 0 : i32
    %c0_i32_0 = arith.constant 0 : i32
    return %arg0, %c0_i32 : i32, i32
  }
}

</mosaic_0001>

<bundles_post_ra>
// kernel: tpu_custom_call.1
= control target key start
LH: loop header
LB: loop body
LE: loop exit
PB: predicated region body
PF: predicated region fallthrough
CT: control target
= control target key end

     0   :  { %7 = vsyncpa [#allocation3], 0  ;;  %s517_s0 = inlined_call_operand.vmem [shape: f32[16,128], index: 0, kind: input, shape index: {}]   ;;  %s518_s1 = inlined_call_operand.vmem [shape: f32[16,2], index: 1, kind: input, shape index: {}]   ;;  %s519_s2 = inlined_call_operand.hbm [shape: f32[16,128], index: 2, kind: output, shape index: {}]  }
   0x1   :  { %9 = vsyncpa [#allocation3 + $0x1], 0  ;;  %s414_s9 = smov 0   ;;  %s416_s10 = smov 0  }
   0x2   :  { %s418_s11 = smov 0   ;;  %s420_s12 = smov 0  }
   0x3 LB: > { %s435_s13 = sadd.s32 4294967295, %s393_s12   ;;  %s274_s14 = sadd.s32 4294967294, %s393_s12   ;;  %s393_s12 = sphi %s420_s12, %s525_s12   ;;  %s389_s11 = sphi %s418_s11, %s524_s11   ;;  %s385_s10 = sphi %s416_s10, %s523_s10   ;;  %s381_s9 = sphi %s414_s9, %s522_s9  }
   0x4   : > { %s439_s15 = sadd.s32 1, %s393_s12   ;;  %s74_s16 = sadd.s32 1, %s389_s11 }
   0x5   : > { %s71_s17 = ssub.s32 %s393_s12, %s439_s15  ;;  %p84_p0 = scmp.ne.s32.totalorder %s389_s11, %s385_s10 }
   0x6   : > { %p72_p1 = scmp.eq.s32.totalorder %s71_s17, 0  ;;  %p85_p2 = scmp.eq.s32.totalorder %s435_s13, 1 }
   0x7   : > { %p90_p3 = scmp.ne.s32.totalorder %s385_s10, %s381_s9  ;;  %p91_p4 = scmp.eq.s32.totalorder %s274_s14, 1 }
   0x8   : > { %s450_s18 = scalar_select %p72_p1, %s389_s11, %s74_s16  }
   0x9   : > { %p452_p5 = por %p85_p2, %p84_p0  ;;  %p456_p6 = por %p91_p4, %p90_p3 }
   0xa   : > { %p277_p7 = scmp.ge.s32.totalorder %s393_s12, 1  ;;  %p123_p8 = scmp.lt.s32.totalorder %s393_s12, 3 }
   0xc   : > { %p124_p9 = pnand %p277_p7, %p123_p8 }
   0xd   : > { %p148_p10 = scmp.lt.s32.totalorder (!%p124_p9), %s435_s13, 1  ;;  %v395_v5 = vmov (!%p124_p9), 0   ;;  %v396_v9 = vmov (!%p124_p9), 1   ;;  %s397_s29 = smov (!%p124_p9), 1  }
   0xe   : > { %127 = sbr.rel (%p124_p9) target bundleno = 596 (0x254), region = 28  ;;  %327 = vset.pattern.permute.xlu1 (!%p124_p9), %v395_v5  ;;  %328 = vset.pattern.permute.xlu0 (!%p124_p9), %v396_v9  ;;  %s145_s30 = sand.u32 (!%p124_p9), 1, %s385_s10  }
   0xf   : > { %s278_s3 = sshll.u32 (!%p124_p9), %s145_s30, 3  ;;  %s282_s4 = sshll.u32 (!%p124_p9), %s435_s13, 7 }
  0x10   : > { %s147_s5 = scalar_lea.vmem (!%p124_p9), [#allocation2], %s278_s3  ;;  %s475_s14 = scalar_lea.hbm (!%p124_p9), %s519_s2, %s282_s4 }
  0x11   : > { %s203_s6 = sshll.u32 (!%p124_p9), %s147_s5, 4  ;;  %s190_s16 = scalar_lea.sflag (!%p124_p9), [#allocation3], %s145_s30  ;;  %s477_s6 = int_to_ptr.vmem [resolvable:$true] %s203_s6 }
  0x12   : > { %s331_s17 = scalar_lea.vmem (!%p124_p9), %s477_s6, 128 }
  0x13   : > { %p332_p11 = scmp.ne.s32.totalorder (!%p124_p9), %s477_s6, %s331_s17 }
  0x15   : > { %s149_s21 = scalar_select %p148_p10, %s435_s13, 1 }
  0x16   : > { %p333_p12 = pnand %p332_p11, %p452_p5  ;;  %s398_s13 = smov [#allocation2]  }
  0x17   : > { %s279_s22 = sshll.u32 %s149_s21, 3  ;;  %s335_s21 = sshll.u32 %s398_s13, 4  ;;  %s336_s21 = int_to_ptr.vmem [resolvable:$false] %s335_s21 }
  0x18   : > { %s151_s25 = scalar_lea.vmem %s517_s0, %s279_s22  ;;  %s155_s28 = scalar_lea.vmem %s518_s1, %s279_s22 }
  0x19   : > { %v156_v0 = vld [vmem:[%s151_s25] sm:$0xff]  ;;  %p334_p13 = pneg %p333_p12  ;;  %s337_s22 = scalar_lea.vmem %s336_s21, 256 }
  0x1a   : > { %158 = vadd.xlane.f32.xlu0 %v156_v0  ;;  %v157_v10 = vld [vmem:[%s155_s28] sm:$0xff]  ;;  %p338_p0 = scmp.lt.s32.totalorder %s477_s6, %s336_s21  ;;  %p339_p1 = scmp.lt.s32.totalorder %s337_s22, %s331_s17 }
  0x1c   : > { %p340_p2 = por %p339_p1, %p338_p0 }
  0x1e   : > { %p341_p3 = pnand %p340_p2, %p334_p13 }
  0xa7   : > { %v159_v1 = vpop.xlane.xlu0 %158 }
  0xa8   : > { %v161_v2 = vmul.f32 0.0078125, %v159_v1 }
  0xaa   : > { %v162_v3 = vsub.f32 %v156_v0, %v161_v2 }
  0xac   : > { %v163_v4 = vmul.f32 %v162_v3, %v162_v3 }
  0xae   : > { %164 = vadd.xlane.f32.xlu0 %v163_v4 }
 0x13b   : > { %v165_v6 = vpop.xlane.xlu0 %164 }
 0x13c   : > { %v166_v7 = vmul.f32 0.0078125, %v165_v6 }
 0x13e   : > { %v167_v8 = vadd.f32 1e-05, %v166_v7 }
 0x140   : > { %329 = vrsqrt.f32 %v167_v8 }
 0x14a   : > { %v330_v11 = vpop.eup %329 }
 0x14b   : > { %v169_v12 = vmul.f32 %v330_v11, %v157_v10 }
 0x14d   : > { %v170_v13 = vmul.f32 %v169_v12, %v161_v2 }
 0x14f   : > { %172 = vrot.lane.b32.xlu1 %v170_v13, %s397_s29 }
 0x153   : > { %178 = vperm.xlu1 %327, %v169_v12  }
 0x1c1   : > { %v173_v14 = vpop.permute.xlu1 %172 }
 0x1c2   : > { %v175_v15 = vsub.f32 %v157_v10, %v173_v14 }
 0x1c4   : > { %184 = vperm.xlu0 %328, %v175_v15  }
 0x1d2   : > { %v179_v16 = vpop.permute.xlu1 %178 }
 0x1d3   : > { %v181_v17 = vmul.f32 %v179_v16, %v156_v0 }
 0x243   : > { %v185_v18 = vpop.permute.xlu0 %184 }
 0x244   : > { %v187_v19 = vadd.f32 %v185_v18, %v181_v17 }
 0x246   : > { %188 = vst [vmem:[%s147_s5] sm:$0xff] %v187_v19 }
 0x247   : > { %344 = shalt.err (!%p341_p3)
}
 0x248   : > { %s345_s23 = scalar_lea.hbm %s475_s14, 128  ;;  %s349_s26 = scalar_lea.hbm %s519_s2, 256 }
 0x249   : > { %p346_p4 = scmp.ne.s32.totalorder %s475_s14, %s345_s23  ;;  %p350_p9 = scmp.lt.u32.totalorder %s475_s14, %s519_s2 }
 0x24a   : > { %p351_p10 = scmp.lt.u32.totalorder %s349_s26, %s345_s23  ;;  %p353_p12 = scmp.lt.u32.totalorder %s345_s23, %s475_s14 }
 0x24b   : > { %p347_p7 = pnand %p346_p4, %p452_p5 }
 0x24c   : > { %p352_p11 = por %p351_p10, %p350_p9 }
 0x24d   : > { %p348_p8 = pneg %p347_p7 }
 0x24e   : > { %p354_p13 = por %p353_p12, %p352_p11 }
 0x250   : > { %p355_p0 = pnand %p354_p13, %p348_p8 }
 0x252   : > { %358 = shalt.err (!%p355_p0)
}
 0x253   : > { %285 = dma.vmem_to_hbm [thread:$0]  (%p452_p5), %s477_s6, 128, %s475_s14, %s190_s16  }
 0x254 PF: > { %p291_p1 = scmp.ge.s32.totalorder %s393_s12, 2  ;;  %s215_s29 = sand.u32 1, %s381_s9  }
 0x255   : > { %s216_s30 = scalar_lea.sflag [#allocation3], %s215_s29 }
 0x256   : > { %p288_p2 = pnand %p291_p1, %p456_p6 }
 0x258   : > { %376 = dma.done.wait (!%p288_p2), %s216_s30, 128  }
 0x259   : > { %378 = vsyncadd (!%p288_p2), %s216_s30, 4294967168  ;;  %p12_p3 = scmp.ge.s32.totalorder %s439_s15, 4   ;;  %s522_s9 = smov %s385_s10 }
 0x25a   : > { %s523_s10 = smov %s389_s11  ;;  %s524_s11 = smov %s450_s18 }
 0x25b   : > { %s525_s12 = smov %s439_s15  ;;  %14 = sbr.rel (!%p12_p3) target bundleno = 3 (0x3), region = 66 }
 0x262   :  { %221 = vsyncpa [#allocation3], 1 }
 0x263   :  { %223 = vsyncpa [#allocation3 + $0x1], 1 }

</bundles_post_ra>
